<compile_context>
chip_gen: v7x
topology: tpu7x:2x2x1
jax: 0.10.0
libtpu: 0.0.40
codegen_flags: <defaults>
</compile_context>

<pallas_src>
import functools

import jax
import jax.numpy as jnp
from jax.experimental import pallas as pl
from jax.experimental.pallas import tpu as pltpu


def _cdiv(a, b):
    return -(-a // b)


def _device_kind():
    try:
        return (jax.devices()[0].device_kind or "").lower()
    except Exception:
        return ""


def _num_tensorcores(kind):
    # v7x has 2 TensorCores per chip; v5e/v6e have 1 (grid is a serial loop).
    return 2 if ("v7" in kind or "7x" in kind) else 1


def _is_v5_class(kind):
    # v5-class MXU is 128 deep: a fused K=384 im2col takes 3 K-passes anyway,
    # so the concatenate only adds copy traffic there.
    return "v5" in kind


def sentiment_cnn_kernel(L, TB, fuse_conv2_im2col,
                         emb_ref, w1_ref, b1_ref, w2_ref, b2_ref,
                         wfc1_ref, bfc1_ref, wfc2_ref, bfc2_ref, out_ref,
                         h1_ref):
    Lp = L // 3
    M1 = TB * L           # rows of the flattened conv1 slab
    M2 = TB * Lp          # rows after maxpool

    # (TB*L, E) channels-last slab; elementwise math in f32 (v5e: no bf16 VPU).
    x = emb_ref[0].astype(jnp.float32)

    def conv1d_same(h, w_ref, b_ref, seq_len, fuse_im2col):
        # 'same' conv1d (k=3, pad=1) applied independently to each length-
        # `seq_len` segment of the flattened (M, Cin) slab.
        M, cin = h.shape
        pos = jax.lax.broadcasted_iota(jnp.int32, (M, 1), 0) % seq_len
        zero = jnp.zeros_like(h)
        # h[l-1] / h[l+1] via XLU roll, zeroed at every sequence boundary
        # (roll matches jnp.roll semantics; wrapped rows are masked anyway).
        h_m1 = jnp.where(pos == 0, zero, pltpu.roll(h, 1, axis=0))
        h_p1 = jnp.where(pos == seq_len - 1, zero, pltpu.roll(h, M - 1, axis=0))
        if fuse_im2col:
            # Lane-tile-aligned: one fused im2col matmul, K = 3*Cin
            # (2 K-passes on the 256-deep v6e/v7x MXU, 1 weight load).
            im2col = jnp.concatenate([h_m1, h, h_p1], axis=1).astype(jnp.bfloat16)
            y = jnp.dot(im2col, w_ref[...], preferred_element_type=jnp.float32)
        else:
            # Three K=Cin matmuls against row-slices of the fused (3*Cin, Cout)
            # weight: used for conv1 (Cin=32, lane-unaligned concat avoided)
            # and for conv2 on v5-class chips (128-deep MXU).
            y = (jnp.dot(h_m1.astype(jnp.bfloat16), w_ref[0:cin, :],
                         preferred_element_type=jnp.float32)
                 + jnp.dot(h.astype(jnp.bfloat16), w_ref[cin:2 * cin, :],
                           preferred_element_type=jnp.float32)
                 + jnp.dot(h_p1.astype(jnp.bfloat16), w_ref[2 * cin:3 * cin, :],
                           preferred_element_type=jnp.float32))
        return y + b_ref[...]

    # conv1 + relu.
    h1 = jnp.maximum(conv1d_same(x, w1_ref, b1_ref, L, False), 0.0)     # (M1, 128)

    # Pre-max the pool window (candidates[l] = max(h1[l], h1[l+1], h1[l+2]))
    # with two XLU rolls (idle slot here) so the pool needs only ONE strided
    # read.  Wrapped / cross-window rows only land at positions l % 3 != 0,
    # which the stride-3 read below never touches (L % 3 == 0).
    cand = jnp.maximum(jnp.maximum(h1, pltpu.roll(h1, M1 - 1, axis=0)),
                       pltpu.roll(h1, M1 - 2, axis=0))
    # TODO(synk): consider a bf16 scratch (halves VMEM + vst/vld traffic) once
    # stride-3 sublane reads on packed bf16 rows are verified on v6e/v7x.
    h1_ref[...] = cand

    # maxpool1d(kernel=3, stride=3): single stride-3 sublane load.
    p1 = h1_ref[pl.ds(0, M2, stride=3), :]                              # (M2, 128)

    # conv2 + relu.
    h2 = jnp.maximum(conv1d_same(p1, w2_ref, b2_ref, Lp, fuse_conv2_im2col),
                     0.0)                                               # (M2, 64)
    # TODO(synk): if TB*L is pushed past ~2K rows, chunk this conv2 section
    # with an inner lax.fori_loop(unroll=True) over row blocks to bound
    # live SSA values (vreg file is 64 x 4 KiB).

    # AdaptiveMaxPool1d(1): global max over each sequence.
    # (Lp % 8 == 0 so this reshape is sublane-tile aligned.)
    g = jnp.max(h2.reshape(TB, Lp, 64), axis=1)                         # (TB, 64)

    # fc1 + relu
    f1 = jnp.maximum(
        jnp.dot(g.astype(jnp.bfloat16), wfc1_ref[...],
                preferred_element_type=jnp.float32) + bfc1_ref[...], 0.0)

    # TODO(synk): nn.Dropout(0.3) is identity at inference; not applied here.

    # fc2 (classes zero-padded to 128 lanes) + sigmoid; lane-dense store.
    logits = (jnp.dot(f1.astype(jnp.bfloat16), wfc2_ref[...],
                      preferred_element_type=jnp.float32) + bfc2_ref[...])
    out_ref[0] = jax.nn.sigmoid(logits)                                 # (TB, 128)


def _choose_tb(B, L, num_tc, target_rows=1536):
    # Target M1 = TB*L ~ 1-2K rows per grid step (per review: 256-row steps
    # were overhead/DMA-setup dominated; 1-2K keeps conv2 intermediates from
    # blowing past the vreg file / VMEM comfort zone).
    tb = max(1, min(B, max(1, target_rows // max(L, 1))))
    if num_tc >= 2 and B >= num_tc:
        # v7x only: make the number of grid steps a multiple of the core count
        # so the "parallel" axis shards evenly across TensorCores.
        g = max(num_tc, _cdiv(B, tb))
        g = _cdiv(g, num_tc) * num_tc
        tb = _cdiv(B, g)
    return tb


def sentiment_cnn_forward(tokens, params, *, tb=None):
    emb_table = params["emb"]
    B, L = tokens.shape
    E = emb_table.shape[1]
    C = params["bfc2"].shape[-1]
    Cp = 128                                   # lane-dense (padded) class dim

    # TODO(synk): general L (MaxPool1d floor-drop, non-8-multiple pooled length)
    # needs per-sequence trailing-row masking; restricted here for tile-aligned
    # pooling / global-max reshapes.
    assert L % 24 == 0, "kernel requires seq_len % 24 == 0 (pool k=3, 8-sublane tiles)"
    assert C <= Cp, "num_classes must be <= 128"
    Lp = L // 3

    kind = _device_kind()
    num_tc = _num_tensorcores(kind)
    fuse_conv2_im2col = not _is_v5_class(kind)

    if tb is None:
        tb = _choose_tb(B, L, num_tc)
    G = _cdiv(B, tb)
    B_pad = G * tb
    if B_pad != B:
        tokens = jnp.concatenate(
            [tokens, jnp.zeros((B_pad - B, L), tokens.dtype)], axis=0)

    # Embedding gather stays in XLA (glue); cast to bf16 to halve HBM->VMEM DMA.
    # TODO(synk): at real model sizes, move the gather in-kernel (scalar-prefetch
    # token ids + manual DMA gather from an HBM-resident table, memory_space=pl.ANY,
    # or a VMEM-resident table with a constant index_map) to avoid paying the
    # (B,L,E) activation stream twice through HBM.
    emb = jnp.take(emb_table, tokens, axis=0).astype(jnp.bfloat16)      # (B_pad, L, E)
    emb = emb.reshape(G, tb * L, E)                                     # flattened slabs

    # Pre-fuse conv weights to (3*Cin, Cout); pad fc2 to 128 output lanes.
    w1f = params["w1"].reshape(3 * E, 128).astype(jnp.bfloat16)
    w2f = params["w2"].reshape(3 * 128, 64).astype(jnp.bfloat16)
    wfc1 = params["wfc1"].astype(jnp.bfloat16)
    wfc2p = jnp.zeros((64, Cp), jnp.float32).at[:, :C].set(params["wfc2"]).astype(jnp.bfloat16)
    bfc2p = jnp.zeros((1, Cp), jnp.float32).at[:, :C].set(params["bfc2"])

    kernel = functools.partial(sentiment_cnn_kernel, L, tb, fuse_conv2_im2col)

    flops = int(2 * B_pad * L * (3 * E) * 128          # conv1
                + 2 * B_pad * Lp * (3 * 128) * 64      # conv2
                + 2 * B_pad * (64 * 64 + 64 * Cp))     # fc1 + fc2
    cost = pl.CostEstimate(
        flops=flops,
        transcendentals=int(B_pad * Cp),
        bytes_accessed=int(emb.size * 2 + w1f.size * 2 + w2f.size * 2
                           + wfc1.size * 2 + wfc2p.size * 2 + B_pad * Cp * 4))

    # Explicit VMEM budget (review NOTE(v7x)): double-buffered input/output
    # blocks + f32 scratch + resident weights + conv2 intermediate headroom.
    vmem_est = (2 * tb * L * E * 2                       # bf16 emb block x2 buffers
                + 2 * tb * Cp * 4                        # f32 output block x2 buffers
                + tb * L * 128 * 4                       # conv1/pool f32 scratch
                + 4 * (w1f.size + w2f.size + wfc1.size + wfc2p.size)   # bf16 weights x2
                + 8 * (128 + 64 + 64 + Cp)               # f32 biases x2
                + 8 * tb * Lp * 128 * 4)                 # p1/rolls/im2col/h2 headroom
    vmem_limit = int(min(64 << 20, max(32 << 20, 2 * vmem_est)))

    out = pl.pallas_call(
        kernel,
        out_shape=jax.ShapeDtypeStruct((G, tb, Cp), jnp.float32),
        grid_spec=pltpu.PrefetchScalarGridSpec(
            num_scalar_prefetch=0,
            grid=(G,),
            in_specs=[
                pl.BlockSpec((1, tb * L, E), lambda b: (b, 0, 0)),   # embeddings
                pl.BlockSpec((3 * E, 128), lambda b: (0, 0)),        # conv1 weight (fused)
                pl.BlockSpec((1, 128), lambda b: (0, 0)),            # conv1 bias
                pl.BlockSpec((3 * 128, 64), lambda b: (0, 0)),       # conv2 weight (fused)
                pl.BlockSpec((1, 64), lambda b: (0, 0)),             # conv2 bias
                pl.BlockSpec((64, 64), lambda b: (0, 0)),            # fc1 weight
                pl.BlockSpec((1, 64), lambda b: (0, 0)),             # fc1 bias
                pl.BlockSpec((64, Cp), lambda b: (0, 0)),            # fc2 weight (padded)
                pl.BlockSpec((1, Cp), lambda b: (0, 0)),             # fc2 bias  (padded)
            ],
            out_specs=pl.BlockSpec((1, tb, Cp), lambda b: (b, 0, 0)),
            scratch_shapes=[pltpu.VMEM((tb * L, 128), jnp.float32)],  # pre-maxed conv1 rows
        ),
        compiler_params=pltpu.CompilerParams(
            dimension_semantics=("parallel",),
            vmem_limit_bytes=vmem_limit),
        cost_estimate=cost,
    )(emb, w1f, params["b1"], w2f, params["b2"],
      wfc1, params["bfc1"], wfc2p, bfc2p)

    return out.reshape(B_pad, Cp)[:B, :C]                              # (B, num_classes)


def init_params(key, vocab_size, embedding_dim, num_classes):
    ks = jax.random.split(key, 9)
    s = 0.1
    # conv weights stored as (k, Cin, Cout) == PyTorch weight permuted (2, 1, 0)
    return {
        "emb":  s * jax.random.normal(ks[0], (vocab_size, embedding_dim), jnp.float32),
        "w1":   s * jax.random.normal(ks[1], (3, embedding_dim, 128), jnp.float32),
        "b1":   s * jax.random.normal(ks[2], (1, 128), jnp.float32),
        "w2":   s * jax.random.normal(ks[3], (3, 128, 64), jnp.float32),
        "b2":   s * jax.random.normal(ks[4], (1, 64), jnp.float32),
        "wfc1": s * jax.random.normal(ks[5], (64, 64), jnp.float32),
        "bfc1": s * jax.random.normal(ks[6], (1, 64), jnp.float32),
        "wfc2": s * jax.random.normal(ks[7], (64, num_classes), jnp.float32),
        "bfc2": s * jax.random.normal(ks[8], (1, num_classes), jnp.float32),
    }


if __name__ == "__main__":
    vocab_size, embedding_dim, num_classes = 100, 32, 2
    batch, seq_len = 2, 24                       # seq % 24 == 0 (pool k=3, 8-row tiles)

    root = jax.random.PRNGKey(0)
    pkey, tkey = jax.random.split(root)
    params = init_params(pkey, vocab_size, embedding_dim, num_classes)
    tokens = jax.random.randint(tkey, (batch, seq_len), 0, vocab_size, dtype=jnp.int32)

    probs = sentiment_cnn_forward(tokens, params)
    jax.block_until_ready(probs)
    assert probs.shape == (batch, num_classes)
    assert bool(jnp.all(jnp.isfinite(probs)))
    print("KERNEL_OK")
</pallas_src>

<mosaic_0001>
module attributes {stable_mosaic.version = 11 : i64} {
  func.func @sentiment_cnn_kernel(%arg0: i32, %arg1: memref<1x48x32xbf16, #tpu.memory_space<vmem>>, %arg2: memref<96x128xbf16, #tpu.memory_space<vmem>>, %arg3: memref<1x128xf32, #tpu.memory_space<vmem>>, %arg4: memref<384x64xbf16, #tpu.memory_space<vmem>>, %arg5: memref<1x64xf32, #tpu.memory_space<vmem>>, %arg6: memref<64x64xbf16, #tpu.memory_space<vmem>>, %arg7: memref<1x64xf32, #tpu.memory_space<vmem>>, %arg8: memref<64x128xbf16, #tpu.memory_space<vmem>>, %arg9: memref<1x128xf32, #tpu.memory_space<vmem>>, %arg10: memref<1x2x128xf32, #tpu.memory_space<vmem>>, %arg11: memref<48x128xf32, #tpu.memory_space<vmem>>) attributes {dimension_semantics = [#tpu.dimension_semantics<parallel>], iteration_bounds = array<i64: 1>, scalar_prefetch = 0 : i64, scratch_operands = 1 : i64, tpu.core_type = #tpu.core_type<tc>, window_params = [{transform_indices = @transform_0, window_bounds = array<i64: 1, 48, 32>}, {pipeline_mode = #tpu.pipeline_mode<synchronous>, transform_indices = @transform_1, window_bounds = array<i64: 96, 128>}, {pipeline_mode = #tpu.pipeline_mode<synchronous>, transform_indices = @transform_2, window_bounds = array<i64: 1, 128>}, {pipeline_mode = #tpu.pipeline_mode<synchronous>, transform_indices = @transform_3, window_bounds = array<i64: 384, 64>}, {pipeline_mode = #tpu.pipeline_mode<synchronous>, transform_indices = @transform_4, window_bounds = array<i64: 1, 64>}, {pipeline_mode = #tpu.pipeline_mode<synchronous>, transform_indices = @transform_5, window_bounds = array<i64: 64, 64>}, {pipeline_mode = #tpu.pipeline_mode<synchronous>, transform_indices = @transform_6, window_bounds = array<i64: 1, 64>}, {pipeline_mode = #tpu.pipeline_mode<synchronous>, transform_indices = @transform_7, window_bounds = array<i64: 64, 128>}, {pipeline_mode = #tpu.pipeline_mode<synchronous>, transform_indices = @transform_8, window_bounds = array<i64: 1, 128>}, {transform_indices = @transform_9, window_bounds = array<i64: 1, 2, 128>}]} {
    %c0 = arith.constant 0 : index
    %c0_0 = arith.constant 0 : index
    %c0_1 = arith.constant 0 : index
    %0 = vector.load %arg1[%c0, %c0_0, %c0_1] : memref<1x48x32xbf16, #tpu.memory_space<vmem>>, vector<1x48x32xbf16>
    %1 = vector.shape_cast %0 : vector<1x48x32xbf16> to vector<48x32xbf16>
    %2 = arith.extf %1 : vector<48x32xbf16> to vector<48x32xf32>
    %3 = tpu.iota {dimensions = array<i32: 0>} : vector<48x1xi32>
    %c24_i32 = arith.constant 24 : i32
    %c0_i32 = arith.constant 0 : i32
    %4 = arith.cmpi eq, %c24_i32, %c0_i32 : i32
    %c1_i32 = arith.constant 1 : i32
    %5 = arith.select %4, %c1_i32, %c24_i32 : i32
    %6 = vector.broadcast %5 : i32 to vector<48x1xi32>
    %7 = arith.remsi %3, %6 : vector<48x1xi32>
    %c0_i32_2 = arith.constant 0 : i32
    %8 = vector.broadcast %c0_i32_2 : i32 to vector<48x1xi32>
    %9 = arith.cmpi ne, %7, %8 : vector<48x1xi32>
    %c0_i32_3 = arith.constant 0 : i32
    %10 = vector.broadcast %c0_i32_3 : i32 to vector<48x1xi32>
    %11 = arith.cmpi slt, %7, %10 : vector<48x1xi32>
    %c0_i32_4 = arith.constant 0 : i32
    %12 = arith.cmpi slt, %5, %c0_i32_4 : i32
    %13 = vector.broadcast %12 : i1 to vector<48x1xi1>
    %14 = vector.broadcast %13 : vector<48x1xi1> to vector<48x1xi1>
    %15 = arith.xori %11, %14 : vector<48x1xi1>
    %16 = arith.andi %15, %9 : vector<48x1xi1>
    %17 = vector.broadcast %5 : i32 to vector<48x1xi32>
    %18 = arith.addi %7, %17 : vector<48x1xi32>
    %19 = arith.select %16, %18, %7 : vector<48x1xi1>, vector<48x1xi32>
    %cst = arith.constant 0.000000e+00 : f32
    %20 = vector.broadcast %cst : f32 to vector<48x32xf32>
    %c0_i32_5 = arith.constant 0 : i32
    %21 = vector.broadcast %c0_i32_5 : i32 to vector<48x1xi32>
    %22 = arith.cmpi eq, %19, %21 : vector<48x1xi32>
    %c1_i32_6 = arith.constant 1 : i32
    %23 = tpu.dynamic_rotate %2 by %c1_i32_6 dim 0 : vector<48x32xf32>, i32 -> vector<48x32xf32>
    %24 = vector.shape_cast %22 : vector<48x1xi1> to vector<48x1xi1>
    %25 = vector.broadcast %24 : vector<48x1xi1> to vector<48x32xi1>
    %26 = arith.select %25, %20, %23 : vector<48x32xi1>, vector<48x32xf32>
    %c23_i32 = arith.constant 23 : i32
    %27 = vector.broadcast %c23_i32 : i32 to vector<48x1xi32>
    %28 = arith.cmpi eq, %19, %27 : vector<48x1xi32>
    %c47_i32 = arith.constant 47 : i32
    %29 = tpu.dynamic_rotate %2 by %c47_i32 dim 0 : vector<48x32xf32>, i32 -> vector<48x32xf32>
    %30 = vector.shape_cast %28 : vector<48x1xi1> to vector<48x1xi1>
    %31 = vector.broadcast %30 : vector<48x1xi1> to vector<48x32xi1>
    %32 = arith.select %31, %20, %29 : vector<48x32xi1>, vector<48x32xf32>
    %33 = arith.truncf %26 : vector<48x32xf32> to vector<48x32xbf16>
    %c0_7 = arith.constant 0 : index
    %c0_8 = arith.constant 0 : index
    %34 = vector.load %arg2[%c0_7, %c0_8] : memref<96x128xbf16, #tpu.memory_space<vmem>>, vector<32x128xbf16>
    %cst_9 = arith.constant dense<0.000000e+00> : vector<48x128xf32>
    %35 = tpu.matmul %33, %34, %cst_9 {dimension_numbers = #tpu.dot_dimension_numbers<[1], [0], [0], [1], [0, 0, 1, 1], [], []>} : vector<48x32xbf16>, vector<32x128xbf16>, vector<48x128xf32> -> vector<48x128xf32>
    %36 = arith.truncf %2 : vector<48x32xf32> to vector<48x32xbf16>
    %c32 = arith.constant 32 : index
    %c0_10 = arith.constant 0 : index
    %37 = vector.load %arg2[%c32, %c0_10] : memref<96x128xbf16, #tpu.memory_space<vmem>>, vector<32x128xbf16>
    %cst_11 = arith.constant dense<0.000000e+00> : vector<48x128xf32>
    %38 = tpu.matmul %36, %37, %cst_11 {dimension_numbers = #tpu.dot_dimension_numbers<[1], [0], [0], [1], [0, 0, 1, 1], [], []>} : vector<48x32xbf16>, vector<32x128xbf16>, vector<48x128xf32> -> vector<48x128xf32>
    %39 = arith.addf %35, %38 : vector<48x128xf32>
    %40 = arith.truncf %32 : vector<48x32xf32> to vector<48x32xbf16>
    %c64 = arith.constant 64 : index
    %c0_12 = arith.constant 0 : index
    %41 = vector.load %arg2[%c64, %c0_12] : memref<96x128xbf16, #tpu.memory_space<vmem>>, vector<32x128xbf16>
    %cst_13 = arith.constant dense<0.000000e+00> : vector<48x128xf32>
    %42 = tpu.matmul %40, %41, %cst_13 {dimension_numbers = #tpu.dot_dimension_numbers<[1], [0], [0], [1], [0, 0, 1, 1], [], []>} : vector<48x32xbf16>, vector<32x128xbf16>, vector<48x128xf32> -> vector<48x128xf32>
    %43 = arith.addf %39, %42 : vector<48x128xf32>
    %c0_14 = arith.constant 0 : index
    %c0_15 = arith.constant 0 : index
    %44 = vector.load %arg3[%c0_14, %c0_15] : memref<1x128xf32, #tpu.memory_space<vmem>>, vector<1x128xf32>
    %45 = vector.broadcast %44 : vector<1x128xf32> to vector<48x128xf32>
    %46 = arith.addf %43, %45 : vector<48x128xf32>
    %cst_16 = arith.constant 0.000000e+00 : f32
    %47 = vector.broadcast %cst_16 : f32 to vector<48x128xf32>
    %48 = arith.maximumf %46, %47 : vector<48x128xf32>
    %c47_i32_17 = arith.constant 47 : i32
    %49 = tpu.dynamic_rotate %48 by %c47_i32_17 dim 0 : vector<48x128xf32>, i32 -> vector<48x128xf32>
    %50 = arith.maximumf %48, %49 : vector<48x128xf32>
    %c46_i32 = arith.constant 46 : i32
    %51 = tpu.dynamic_rotate %48 by %c46_i32 dim 0 : vector<48x128xf32>, i32 -> vector<48x128xf32>
    %52 = arith.maximumf %50, %51 : vector<48x128xf32>
    %c0_18 = arith.constant 0 : index
    %c0_19 = arith.constant 0 : index
    %53 = vector.load %arg11[%c0_18, %c0_19] : memref<48x128xf32, #tpu.memory_space<vmem>>, vector<48x128xf32>
    tpu.vector_store %arg11[%c0_18, %c0_19], %52 {strides = array<i32>} : memref<48x128xf32, #tpu.memory_space<vmem>>, vector<48x128xf32>,
    %c0_20 = arith.constant 0 : index
    %c0_21 = arith.constant 0 : index
    %54 = tpu.strided_load %arg11[%c0_20, %c0_21] {strides = array<i32: 3, 1>} : memref<48x128xf32, #tpu.memory_space<vmem>>, vector<16x128xf32>
    %55 = tpu.iota {dimensions = array<i32: 0>} : vector<16x1xi32>
    %c8_i32 = arith.constant 8 : i32
    %c0_i32_22 = arith.constant 0 : i32
    %56 = arith.cmpi eq, %c8_i32, %c0_i32_22 : i32
    %c1_i32_23 = arith.constant 1 : i32
    %57 = arith.select %56, %c1_i32_23, %c8_i32 : i32
    %58 = vector.broadcast %57 : i32 to vector<16x1xi32>
    %59 = arith.remsi %55, %58 : vector<16x1xi32>
    %c0_i32_24 = arith.constant 0 : i32
    %60 = vector.broadcast %c0_i32_24 : i32 to vector<16x1xi32>
    %61 = arith.cmpi ne, %59, %60 : vector<16x1xi32>
    %c0_i32_25 = arith.constant 0 : i32
    %62 = vector.broadcast %c0_i32_25 : i32 to vector<16x1xi32>
    %63 = arith.cmpi slt, %59, %62 : vector<16x1xi32>
    %c0_i32_26 = arith.constant 0 : i32
    %64 = arith.cmpi slt, %57, %c0_i32_26 : i32
    %65 = vector.broadcast %64 : i1 to vector<16x1xi1>
    %66 = vector.broadcast %65 : vector<16x1xi1> to vector<16x1xi1>
    %67 = arith.xori %63, %66 : vector<16x1xi1>
    %68 = arith.andi %67, %61 : vector<16x1xi1>
    %69 = vector.broadcast %57 : i32 to vector<16x1xi32>
    %70 = arith.addi %59, %69 : vector<16x1xi32>
    %71 = arith.select %68, %70, %59 : vector<16x1xi1>, vector<16x1xi32>
    %cst_27 = arith.constant 0.000000e+00 : f32
    %72 = vector.broadcast %cst_27 : f32 to vector<16x128xf32>
    %c0_i32_28 = arith.constant 0 : i32
    %73 = vector.broadcast %c0_i32_28 : i32 to vector<16x1xi32>
    %74 = arith.cmpi eq, %71, %73 : vector<16x1xi32>
    %c1_i32_29 = arith.constant 1 : i32
    %75 = tpu.dynamic_rotate %54 by %c1_i32_29 dim 0 : vector<16x128xf32>, i32 -> vector<16x128xf32>
    %76 = vector.shape_cast %74 : vector<16x1xi1> to vector<16x1xi1>
    %77 = vector.broadcast %76 : vector<16x1xi1> to vector<16x128xi1>
    %78 = arith.select %77, %72, %75 : vector<16x128xi1>, vector<16x128xf32>
    %c7_i32 = arith.constant 7 : i32
    %79 = vector.broadcast %c7_i32 : i32 to vector<16x1xi32>
    %80 = arith.cmpi eq, %71, %79 : vector<16x1xi32>
    %c15_i32 = arith.constant 15 : i32
    %81 = tpu.dynamic_rotate %54 by %c15_i32 dim 0 : vector<16x128xf32>, i32 -> vector<16x128xf32>
    %82 = vector.shape_cast %80 : vector<16x1xi1> to vector<16x1xi1>
    %83 = vector.broadcast %82 : vector<16x1xi1> to vector<16x128xi1>
    %84 = arith.select %83, %72, %81 : vector<16x128xi1>, vector<16x128xf32>
    %85 = tpu.concatenate %78, %54, %84 in 1 : vector<16x128xf32>, vector<16x128xf32>, vector<16x128xf32> -> vector<16x384xf32>
    %86 = arith.truncf %85 : vector<16x384xf32> to vector<16x384xbf16>
    %c0_30 = arith.constant 0 : index
    %c0_31 = arith.constant 0 : index
    %87 = vector.load %arg4[%c0_30, %c0_31] : memref<384x64xbf16, #tpu.memory_space<vmem>>, vector<384x64xbf16>
    %cst_32 = arith.constant dense<0.000000e+00> : vector<16x64xf32>
    %88 = tpu.matmul %86, %87, %cst_32 {dimension_numbers = #tpu.dot_dimension_numbers<[1], [0], [0], [1], [0, 0, 1, 1], [], []>} : vector<16x384xbf16>, vector<384x64xbf16>, vector<16x64xf32> -> vector<16x64xf32>
    %c0_33 = arith.constant 0 : index
    %c0_34 = arith.constant 0 : index
    %89 = vector.load %arg5[%c0_33, %c0_34] : memref<1x64xf32, #tpu.memory_space<vmem>>, vector<1x64xf32>
    %90 = vector.broadcast %89 : vector<1x64xf32> to vector<16x64xf32>
    %91 = arith.addf %88, %90 : vector<16x64xf32>
    %cst_35 = arith.constant 0.000000e+00 : f32
    %92 = vector.broadcast %cst_35 : f32 to vector<16x64xf32>
    %93 = arith.maximumf %91, %92 : vector<16x64xf32>
    %94 = vector.shape_cast %93 : vector<16x64xf32> to vector<2x8x64xf32>
    %cst_36 = arith.constant dense<0xFF800000> : vector<2x64xf32>
    %95 = vector.multi_reduction <maximumf>, %94, %cst_36 [1] : vector<2x8x64xf32> to vector<2x64xf32>
    %96 = arith.truncf %95 : vector<2x64xf32> to vector<2x64xbf16>
    %c0_37 = arith.constant 0 : index
    %c0_38 = arith.constant 0 : index
    %97 = vector.load %arg6[%c0_37, %c0_38] : memref<64x64xbf16, #tpu.memory_space<vmem>>, vector<64x64xbf16>
    %cst_39 = arith.constant dense<0.000000e+00> : vector<2x64xf32>
    %98 = tpu.matmul %96, %97, %cst_39 {dimension_numbers = #tpu.dot_dimension_numbers<[1], [0], [0], [1], [0, 0, 1, 1], [], []>} : vector<2x64xbf16>, vector<64x64xbf16>, vector<2x64xf32> -> vector<2x64xf32>
    %c0_40 = arith.constant 0 : index
    %c0_41 = arith.constant 0 : index
    %99 = vector.load %arg7[%c0_40, %c0_41] : memref<1x64xf32, #tpu.memory_space<vmem>>, vector<1x64xf32>
    %100 = vector.broadcast %99 : vector<1x64xf32> to vector<2x64xf32>
    %101 = arith.addf %98, %100 : vector<2x64xf32>
    %cst_42 = arith.constant 0.000000e+00 : f32
    %102 = vector.broadcast %cst_42 : f32 to vector<2x64xf32>
    %103 = arith.maximumf %101, %102 : vector<2x64xf32>
    %104 = arith.truncf %103 : vector<2x64xf32> to vector<2x64xbf16>
    %c0_43 = arith.constant 0 : index
    %c0_44 = arith.constant 0 : index
    %105 = vector.load %arg8[%c0_43, %c0_44] : memref<64x128xbf16, #tpu.memory_space<vmem>>, vector<64x128xbf16>
    %cst_45 = arith.constant dense<0.000000e+00> : vector<2x128xf32>
    %106 = tpu.matmul %104, %105, %cst_45 {dimension_numbers = #tpu.dot_dimension_numbers<[1], [0], [0], [1], [0, 0, 1, 1], [], []>} : vector<2x64xbf16>, vector<64x128xbf16>, vector<2x128xf32> -> vector<2x128xf32>
    %c0_46 = arith.constant 0 : index
    %c0_47 = arith.constant 0 : index
    %107 = vector.load %arg9[%c0_46, %c0_47] : memref<1x128xf32, #tpu.memory_space<vmem>>, vector<1x128xf32>
    %108 = vector.broadcast %107 : vector<1x128xf32> to vector<2x128xf32>
    %109 = arith.addf %106, %108 : vector<2x128xf32>
    %110 = arith.negf %109 : vector<2x128xf32>
    %111 = math.exp %110 : vector<2x128xf32>
    %cst_48 = arith.constant 1.000000e+00 : f32
    %112 = vector.broadcast %cst_48 : f32 to vector<2x128xf32>
    %113 = arith.addf %112, %111 : vector<2x128xf32>
    %114 = arith.divf %112, %113 : vector<2x128xf32>
    %c0_49 = arith.constant 0 : index
    %c0_50 = arith.constant 0 : index
    %c0_51 = arith.constant 0 : index
    %115 = vector.load %arg10[%c0_49, %c0_50, %c0_51] : memref<1x2x128xf32, #tpu.memory_space<vmem>>, vector<1x2x128xf32>
    %116 = vector.shape_cast %115 : vector<1x2x128xf32> to vector<2x128xf32>
    %117 = vector.shape_cast %114 : vector<2x128xf32> to vector<1x2x128xf32>
    tpu.vector_store %arg10[%c0_49, %c0_50, %c0_51], %117 {strides = array<i32>} : memref<1x2x128xf32, #tpu.memory_space<vmem>>, vector<1x2x128xf32>,
    return
  }
  func.func @transform_0(%arg0: i32) -> (i32, i32, i32) {
    %c0_i32 = arith.constant 0 : i32
    %c0_i32_0 = arith.constant 0 : i32
    %c0_i32_1 = arith.constant 0 : i32
    return %arg0, %c0_i32, %c0_i32_0 : i32, i32, i32
  }
  func.func @transform_1(%arg0: i32) -> (i32, i32) {
    %c0_i32 = arith.constant 0 : i32
    %c0_i32_0 = arith.constant 0 : i32
    %c0_i32_1 = arith.constant 0 : i32
    return %c0_i32, %c0_i32_0 : i32, i32
  }
  func.func @transform_2(%arg0: i32) -> (i32, i32) {
    %c0_i32 = arith.constant 0 : i32
    %c0_i32_0 = arith.constant 0 : i32
    %c0_i32_1 = arith.constant 0 : i32
    return %c0_i32, %c0_i32_0 : i32, i32
  }
  func.func @transform_3(%arg0: i32) -> (i32, i32) {
    %c0_i32 = arith.constant 0 : i32
    %c0_i32_0 = arith.constant 0 : i32
    %c0_i32_1 = arith.constant 0 : i32
    return %c0_i32, %c0_i32_0 : i32, i32
  }
  func.func @transform_4(%arg0: i32) -> (i32, i32) {
    %c0_i32 = arith.constant 0 : i32
    %c0_i32_0 = arith.constant 0 : i32
    %c0_i32_1 = arith.constant 0 : i32
    return %c0_i32, %c0_i32_0 : i32, i32
  }
  func.func @transform_5(%arg0: i32) -> (i32, i32) {
    %c0_i32 = arith.constant 0 : i32
    %c0_i32_0 = arith.constant 0 : i32
    %c0_i32_1 = arith.constant 0 : i32
    return %c0_i32, %c0_i32_0 : i32, i32
  }
  func.func @transform_6(%arg0: i32) -> (i32, i32) {
    %c0_i32 = arith.constant 0 : i32
    %c0_i32_0 = arith.constant 0 : i32
    %c0_i32_1 = arith.constant 0 : i32
    return %c0_i32, %c0_i32_0 : i32, i32
  }
  func.func @transform_7(%arg0: i32) -> (i32, i32) {
    %c0_i32 = arith.constant 0 : i32
    %c0_i32_0 = arith.constant 0 : i32
    %c0_i32_1 = arith.constant 0 : i32
    return %c0_i32, %c0_i32_0 : i32, i32
  }
  func.func @transform_8(%arg0: i32) -> (i32, i32) {
    %c0_i32 = arith.constant 0 : i32
    %c0_i32_0 = arith.constant 0 : i32
    %c0_i32_1 = arith.constant 0 : i32
    return %c0_i32, %c0_i32_0 : i32, i32
  }
  func.func @transform_9(%arg0: i32) -> (i32, i32, i32) {
    %c0_i32 = arith.constant 0 : i32
    %c0_i32_0 = arith.constant 0 : i32
    %c0_i32_1 = arith.constant 0 : i32
    return %arg0, %c0_i32, %c0_i32_0 : i32, i32, i32
  }
}

</mosaic_0001>

<bundles_post_ra>
// kernel: tpu_custom_call.1
= control target key start
LH: loop header
LB: loop body
LE: loop exit
PB: predicated region body
PF: predicated region fallthrough
CT: control target
= control target key end

     0   :  { %v46_v1 = vlaneseq  ;;  %v1413_v2 = vmov 0.0   ;;  %vm1414_vm0 = vmmov 0   ;;  %vm261_vm1 = vcmask 261120   ;;  %s1844_s0 = inlined_call_operand.vmem [shape: bf16[1,48,32], index: 0, kind: input, shape index: {}]   ;;  %s1845_s1 = inlined_call_operand.vmem [shape: bf16[96,128], index: 1, kind: input, shape index: {}]   ;;  %s1846_s2 = inlined_call_operand.vmem [shape: f32[1,128], index: 2, kind: input, shape index: {}]   ;;  %s1847_s3 = inlined_call_operand.vmem [shape: bf16[384,64], index: 3, kind: input, shape index: {}]   ;;  %s1848_s4 = inlined_call_operand.vmem [shape: f32[1,64], index: 4, kind: input, shape index: {}]   ;;  %s1849_s5 = inlined_call_operand.vmem [shape: bf16[64,64], index: 5, kind: input, shape index: {}]   ;;  %s1850_s6 = inlined_call_operand.vmem [shape: f32[1,64], index: 6, kind: input, shape index: {}]   ;;  %s1851_s7 = inlined_call_operand.vmem [shape: bf16[64,128], index: 7, kind: input, shape index: {}]   ;;  %s1852_s8 = inlined_call_operand.vmem [shape: f32[1,128], index: 8, kind: input, shape index: {}]   ;;  %s1853_s9 = inlined_call_operand.hbm [shape: f32[1,2,128], index: 9, kind: output, shape index: {}]  }
   0x1   :  { %v1341_v0 = vld [vmem:[%s1845_s1 + $0x10] sm:$0xff]   ;;  %1234 = vmatprep.subr.bf16.mxu0 %v1413_v2  ;;  %v1342_v3 = vld [vmem:[%s1845_s1 + $0x18] sm:$0xff]   ;;  %1250 = vmatprep.subr.bf16.mxu1 %v1413_v2  ;;  %v34_v4 = vld [vmem:[%s1844_s0] sm:$0xff]  }
   0x2   :  { %1235 = vmatpush3.bf16.msra.mxu0 %v1341_v0  ;;  %1238 = vmatprep.mubr.msk.bf16.mxu0 %vm1414_vm0, %v1413_v2  ;;  %v40_v5 = vunpack.c.l.bf16 %v34_v4  ;;  %v41_v6 = vunpack.c.h.bf16 %v34_v4  ;;  %v1482_v7 = vshrl.u32 %v46_v1, 7  ;;  %v1345_v8 = vld [vmem:[%s1845_s1] sm:$0xff]   ;;  %v36_v11 = vld [vmem:[%s1844_s0 + $0x8] sm:$0xff]   ;;  %v1498_v16 = vld [vmem:[%s1844_s0 + $0x10] sm:$0xff]  }
   0x3   :  { %1236 = vmatprep.subr.bf16.mxu0 %v1413_v2  ;;  %1254 = vmatprep.mubr.msk.bf16.mxu1 %vm1414_vm0, %v1413_v2  ;;  %v1344_v13 = vld [vmem:[%s1845_s1 + $0x20] sm:$0xff]   ;;  %v42_v14 = vunpack.c.l.bf16 %v36_v11  ;;  %v43_v15 = vunpack.c.h.bf16 %v36_v11  ;;  %v1347_v19 = vld [vmem:[%s1845_s1 + $0x8] sm:$0xff]   ;;  %v45_v20 = vunpack.c.h.bf16 %v1498_v16  ;;  %v44_v30 = vunpack.c.l.bf16 %v1498_v16 }
   0x4   :  { %v155_v9 = vrot.slane %v40_v5, 7  ;;  %v156_v10 = vrot.slane %v41_v6, 7  ;;  %v1490_v12 = vrot.slane %v40_v5, 1  ;;  %1251 = vmatpush3.bf16.msra.mxu1 %v1345_v8  ;;  %v1501_v17 = vadd.s32 8, %v1482_v7  ;;  %v1348_v25 = vld [vmem:[%s1845_s1 + $0x28] sm:$0xff]  }
   0x5   :  { %v193_v18 = vrot.slane %v41_v6, 1  ;;  %1252 = vmatprep.subr.bf16.mxu1 %v1413_v2  ;;  %v1510_v21 = vmul.u32.u64.low 2863311531, %v1482_v7  ;;  %v1511_v22 = vmul.u32.u64.high 2863311531, %v1482_v7, %v1510_v21  ;;  %v157_v23 = vrot.slane %v42_v14, 7 }
   0x6   :  { %1237 = vmatpush3.bf16.msra.mxu0 %v1342_v3  ;;  %v1513_v24 = vrot.slane %v42_v14, 1  ;;  %vm161_vm2 = vcmp.lt.s32.totalorder %v1482_v7, 1  ;;  %v1520_v26 = vrot.slane %v43_v15, 7  ;;  %v1528_v29 = vrot.slane %v45_v20, 7 }
   0x7   :  { %1266 = vmatprep.subr.bf16.mxu0 %v1413_v2  ;;  %v1523_v27 = vmul.u32.u64.low 2863311531, %v1501_v17  ;;  %v1524_v28 = vmul.u32.u64.high 2863311531, %v1501_v17, %v1523_v27  ;;  %vm198_vm3 = vcmp.lt.s32.totalorder %v1482_v7, 7  ;;  %v49_v31 = vadd.s32 16, %v1482_v7 }
   0x8   :  { %v1535_v32 = vrot.slane %v43_v15, 1  ;;  %1253 = vmatpush3.bf16.msra.mxu1 %v1347_v19  ;;  %v59_v33 = vshrl.u32 %v1511_v22, 4  ;;  %v166_v34 = vsel %vm161_vm2, %v155_v9, %v156_v10  ;;  %v167_v35 = vsel %vm161_vm2, %v1528_v29, %v155_v9 }
   0x9   :  { %1239 = vmatmul.mubr.msk.bf16.vlgmr.msra.gmra.mrb[0].mxu0 %vm261_vm1, %v34_v4  ;;  %v202_v36 = vsel %vm198_vm3, %v193_v18, %v1513_v24  ;;  %v1547_v37 = vrot.slane %v44_v30, 7  ;;  %v50_v38 = vadd.s32 24, %v1482_v7  ;;  %v70_v40 = vshrl.u32 %v1524_v28, 4 }
   0xa   :  { %1267 = vmatpush3.bf16.msra.mxu0 %v1344_v13  ;;  %1242 = vmatprep.mubr.msk.bf16.mxu0 %vm1414_vm0, %v1413_v2  ;;  %v60_v39 = vmul.u32 24, %v59_v33  ;;  %v1551_v41 = vmul.u32.u64.low 2863311531, %v49_v31  ;;  %v1552_v42 = vmul.u32.u64.high 2863311531, %v49_v31, %v1551_v41  ;;  %v1554_v43 = vrot.slane %v44_v30, 1 }
   0xb   :  { %1268 = vmatprep.subr.bf16.mxu0 %v1413_v2  ;;  %v1556_v44 = vmul.u32.u64.low 2863311531, %v50_v38  ;;  %v1557_v45 = vmul.u32.u64.high 2863311531, %v50_v38, %v1556_v44  ;;  %v51_v46 = vadd.s32 32, %v1482_v7  ;;  %v71_v48 = vmul.u32 24, %v70_v40 }
   0xc   :  { %v61_v47 = vsub.s32 %v1482_v7, %v60_v39  ;;  %v203_v49 = vsel %vm198_vm3, %v1490_v12, %v193_v18  ;;  %v1565_v50 = vadd.s32 40, %v1482_v7  ;;  %v1571_v51 = vsel %vm161_vm2, %v157_v23, %v1520_v26 }
   0xd   :  { %v165_v52 = vsel %vm161_vm2, %v156_v10, %v157_v23  ;;  %v1575_v53 = vmul.u32.u64.low 2863311531, %v51_v46  ;;  %v1576_v54 = vmul.u32.u64.high 2863311531, %v51_v46, %v1575_v53  ;;  %v72_v55 = vsub.s32 %v1501_v17, %v71_v48 }
   0xe   :  { %1269 = vmatpush3.bf16.msra.mxu0 %v1348_v25  ;;  %vm119_vm4 = vcmp.ne.s32.totalorder %v61_v47, 0  ;;  %vm125_vm5 = vcmp.lt.s32.totalorder %v61_v47, 0  ;;  %v137_v56 = vadd.s32 24, %v61_v47  ;;  %v81_v57 = vshrl.u32 %v1552_v42, 4 }
   0xf   :  { %1282 = vmatprep.subr.bf16.mxu0 %v1413_v2  ;;  %vm131_vm6 = vmand %vm125_vm5, %vm119_vm4  ;;  %v92_v58 = vshrl.u32 %v1557_v45, 4  ;;  %v1585_v59 = vmul.u32.u64.low 2863311531, %v1565_v50  ;;  %v1586_v60 = vmul.u32.u64.high 2863311531, %v1565_v50, %v1585_v59  ;;  %vm120_vm7 = vcmp.ne.s32.totalorder %v72_v55, 0 }
  0x10   :  { %vm126_vm8 = vcmp.lt.s32.totalorder %v72_v55, 0  ;;  %v138_v61 = vadd.s32 24, %v72_v55  ;;  %v143_v62 = vsel %vm131_vm6, %v137_v56, %v61_v47  ;;  %v82_v63 = vmul.u32 24, %v81_v57 }
  0x11   :  { %1243 = vmatmul.mubr.msk.bf16.gmra.mrb[4].mxu0 %vm261_vm1, %v36_v11  ;;  %vm132_vm9 = vmand %vm126_vm8, %vm120_vm7  ;;  %vm149_vm10 = vcmp.eq.s32.totalorder %v143_v62, 0  ;;  %vm186_vm11 = vcmp.eq.s32.totalorder %v143_v62, 23  ;;  %v93_v0 = vmul.u32 24, %v92_v58  ;;  %v103_v5 = vshrl.u32 %v1576_v54, 4 }
  0x12   :  { %1246 = vmatprep.mubr.msk.bf16.mxu0 %vm1414_vm0, %v1413_v2  ;;  %v144_v1 = vsel %vm132_vm9, %v138_v61, %v72_v55  ;;  %v180_v3 = vsel %vm149_vm10, 0.0, %v167_v35  ;;  %v217_v4 = vsel %vm186_vm11, 0.0, %v203_v49  ;;  %v83_v6 = vsub.s32 %v49_v31, %v82_v63 }
  0x13   :  { %vm150_vm12 = vcmp.eq.s32.totalorder %v144_v1, 0  ;;  %vm187_vm13 = vcmp.eq.s32.totalorder %v144_v1, 23  ;;  %v94_v8 = vsub.s32 %v50_v38, %v93_v0  ;;  %v104_v11 = vmul.u32 24, %v103_v5 }
  0x14   :  { %v181_v9 = vsel %vm150_vm12, 0.0, %v166_v34  ;;  %v218_v10 = vsel %vm187_vm13, 0.0, %v202_v36  ;;  %v114_v13 = vshrl.u32 %v1586_v60, 4  ;;  %vm121_vm14 = vcmp.ne.s32.totalorder %v83_v6, 0 }
  0x15   :  { %v223_v14 = vpack.c.bf16 %v181_v9, %v180_v3  ;;  %vm122_vm15 = vcmp.ne.s32.totalorder %v94_v8, 0  ;;  %v162_v15 = vsel %vm161_vm2, %v1547_v37, %v1528_v29  ;;  %vm127_vm4 = vcmp.lt.s32.totalorder %v83_v6, 0 }
  0x16   :  { %vm128_vm5 = vcmp.lt.s32.totalorder %v94_v8, 0  ;;  %v139_v18 = vadd.s32 24, %v83_v6  ;;  %v140_v19 = vadd.s32 24, %v94_v8  ;;  %vm133_vm6 = vmand %vm127_vm4, %vm121_vm14  ;;  %v105_v21 = vsub.s32 %v51_v46, %v104_v11 }
  0x17   :  { %1255 = vmatmul.mubr.msk.bf16.vlgmr.msra.gmra.mrb[0].mxu1 %vm261_vm1, %v223_v14  ;;  %v115_v22 = vmul.u32 24, %v114_v13  ;;  %v163_v23 = vsel %vm161_vm2, %v1520_v26, %v1547_v37  ;;  %v200_v25 = vsel %vm198_vm3, %v1535_v32, %v1554_v43  ;;  %v406_v27 = vpack.c.bf16 %v218_v10, %v217_v4  ;;  %vm134_vm7 = vmand %vm128_vm5, %vm122_vm15 }
  0x18   :  { %1258 = vmatprep.mubr.msk.bf16.mxu1 %vm1414_vm0, %v1413_v2  ;;  %v145_v28 = vsel %vm133_vm6, %v139_v18, %v83_v6  ;;  %v201_v29 = vsel %vm198_vm3, %v1513_v24, %v1535_v32  ;;  %v197_v26 = vrot.slane %v45_v20, 1  ;;  %v146_v30 = vsel %vm134_vm7, %v140_v19, %v94_v8 }
  0x19   :  { %1247 = vmatmul.mubr.msk.bf16.gmra.mrb[8].mxu0 %vm261_vm1, %v1498_v16  ;;  %vm151_vm8 = vcmp.eq.s32.totalorder %v145_v28, 0  ;;  %v116_v31 = vsub.s32 %v1565_v50, %v115_v22  ;;  %vm123_vm9 = vcmp.ne.s32.totalorder %v105_v21, 0  ;;  %vm152_vm10 = vcmp.eq.s32.totalorder %v146_v30, 0 }
  0x1a   :  { %1270 = vmatprep.mubr.msk.bf16.mxu0 %vm1414_vm0, %v1413_v2  ;;  %v182_v33 = vsel %vm151_vm8, 0.0, %v165_v52  ;;  %vm129_vm11 = vcmp.lt.s32.totalorder %v105_v21, 0  ;;  %v141_v34 = vadd.s32 24, %v105_v21  ;;  %v183_v35 = vsel %vm152_vm10, 0.0, %v1571_v51 }
  0x1b   :  { %vm124_vm12 = vcmp.ne.s32.totalorder %v116_v31, 0  ;;  %vm130_vm13 = vcmp.lt.s32.totalorder %v116_v31, 0  ;;  %vm135_vm14 = vmand %vm129_vm11, %vm123_vm9  ;;  %v142_v36 = vadd.s32 24, %v116_v31  ;;  %v224_v37 = vpack.c.bf16 %v183_v35, %v182_v33 }
  0x1c   :  { %vm136_vm15 = vmand %vm130_vm13, %vm124_vm12  ;;  %v147_v24 = vsel %vm135_vm14, %v141_v34, %v105_v21  ;;  %vm188_vm4 = vcmp.eq.s32.totalorder %v145_v28, 23  ;;  %vm189_vm5 = vcmp.eq.s32.totalorder %v146_v30, 23  ;;  %v199_v40 = vsel %vm198_vm3, %v1554_v43, %v197_v26 }
  0x1d   :  { %v148_v16 = vsel %vm136_vm15, %v142_v36, %v116_v31  ;;  %vm153_vm6 = vcmp.eq.s32.totalorder %v147_v24, 0  ;;  %v219_v20 = vsel %vm188_vm4, 0.0, %v201_v29  ;;  %v220_v38 = vsel %vm189_vm5, 0.0, %v200_v25 }
  0x1e   :  { %vm154_vm7 = vcmp.eq.s32.totalorder %v148_v16, 0  ;;  %v184_v32 = vsel %vm153_vm6, 0.0, %v163_v23  ;;  %vm190_vm8 = vcmp.eq.s32.totalorder %v147_v24, 23  ;;  %vm191_vm9 = vcmp.eq.s32.totalorder %v148_v16, 23 }
  0x1f   :  { %1259 = vmatmul.mubr.msk.bf16.gmra.mrb[4].mxu1 %vm261_vm1, %v224_v37  ;;  %v185_v39 = vsel %vm154_vm7, 0.0, %v162_v15  ;;  %v204_v41 = vsel %vm198_vm3, %v197_v26, %v1490_v12  ;;  %v221_v42 = vsel %vm190_vm8, 0.0, %v199_v40  ;;  %v407_v45 = vpack.c.bf16 %v220_v38, %v219_v20 }
  0x20   :  { %1262 = vmatprep.mubr.msk.bf16.mxu1 %vm1414_vm0, %v1413_v2  ;;  %v222_v44 = vsel %vm191_vm9, 0.0, %v204_v41  ;;  %v225_v46 = vpack.c.bf16 %v185_v39, %v184_v32 }
  0x21   :  { %1271 = vmatmul.mubr.msk.bf16.vlgmr.msra.gmra.mrb[12].mxu0 %vm261_vm1, %v406_v27 }
  0x22   :  { %1274 = vmatprep.mubr.msk.bf16.mxu0 %vm1414_vm0, %v1413_v2 }
  0x27   :  { %1263 = vmatmul.mubr.msk.bf16.gmra.mrb[8].mxu1 %vm261_vm1, %v225_v46 }
  0x29   :  { %1275 = vmatmul.mubr.msk.bf16.gmra.mrb[16].mxu0 %vm261_vm1, %v407_v45 }
  0x2a   :  { %1278 = vmatprep.mubr.msk.bf16.mxu0 %vm1414_vm0, %v1413_v2 }
  0x2b   :  { %14 = vsyncpa [#allocation4], 0  ;;  %v408_v43 = vpack.c.bf16 %v222_v44, %v221_v42  ;;  %v1350_v12 = vld [vmem:[%s1847_s3 + $0x40] sm:$0xff]   ;;  %v1353_v49 = vld [vmem:[%s1847_s3 + $0x48] sm:$0xff]  }
  0x2c   :  { %v1351_v47 = vld [vmem:[%s1847_s3] sm:$0xff]   ;;  %1193 = vmatprep.subr.bf16.mxu1 %v1350_v12  ;;  %v1354_v50 = vld [vmem:[%s1847_s3 + $0x8] sm:$0xff]   ;;  %v1356_v52 = vld [vmem:[%s1847_s3 + $0x50] sm:$0xff]  }
  0x2d   :  { %v1352_v48 = vld [vmem:[%s1847_s3 + $0x80] sm:$0xff]   ;;  %1194 = vmatpush3.bf16.msra.mxu1 %v1351_v47  ;;  %v1355_v51 = vld [vmem:[%s1847_s3 + $0x88] sm:$0xff]   ;;  %v1357_v53 = vld [vmem:[%s1847_s3 + $0x10] sm:$0xff]  }
  0x2e   :  { %1283 = vmatpush3.bf16.msra.mxu0 %v1352_v48  ;;  %1195 = vmatprep.subr.bf16.mxu1 %v1353_v49  ;;  %v1358_v54 = vld [vmem:[%s1847_s3 + $0x90] sm:$0xff]   ;;  %v1359_v55 = vld [vmem:[%s1847_s3 + $0x58] sm:$0xff]   ;;  %v1362_v58 = vld [vmem:[%s1847_s3 + $0x60] sm:$0xff]  }
  0x2f   :  { %1284 = vmatprep.subr.bf16.mxu0 %v1413_v2  ;;  %v1360_v56 = vld [vmem:[%s1847_s3 + $0x18] sm:$0xff]   ;;  %v1363_v59 = vld [vmem:[%s1847_s3 + $0x20] sm:$0xff]   ;;  %v1365_v61 = vld [vmem:[%s1847_s3 + $0x68] sm:$0xff]  }
  0x30   :  { %v1361_v57 = vld [vmem:[%s1847_s3 + $0x98] sm:$0xff]   ;;  %v1364_v60 = vld [vmem:[%s1847_s3 + $0xa0] sm:$0xff]   ;;  %v1366_v62 = vld [vmem:[%s1847_s3 + $0x28] sm:$0xff]  }
  0x31   :  { %1279 = vmatmul.mubr.msk.bf16.gmra.mrb[20].mxu0 %vm261_vm1, %v408_v43  ;;  %1196 = vmatpush3.bf16.msra.mxu1 %v1354_v50  ;;  %v1367_v63 = vld [vmem:[%s1847_s3 + $0xa8] sm:$0xff]   ;;  %v1368_v0 = vld [vmem:[%s1847_s3 + $0x70] sm:$0xff]   ;;  %v1371_v4 = vld [vmem:[%s1847_s3 + $0x78] sm:$0xff]   ;;  %vm540_vm1 = vcmp.lt.s32.totalorder %v1482_v7, 6 }
  0x32   :  { %1298 = vmatprep.mubr.msk.bf16.mxu0 %vm1414_vm0, %v1413_v2  ;;  %1285 = vmatpush3.bf16.msra.mxu0 %v1355_v51  ;;  %v1369_v1 = vld [vmem:[%s1847_s3 + $0x30] sm:$0xff]   ;;  %v1372_v5 = vld [vmem:[%s1847_s3 + $0x38] sm:$0xff]   ;;  %v1125_v33 = vld [vmem:[%s1846_s2] ss:$0 sm:$0xff] }
  0x33   :  { %1286 = vmatprep.subr.bf16.mxu0 %v1413_v2  ;;  %1197 = vmatprep.subr.bf16.mxu1 %v1356_v52  ;;  %v1370_v3 = vld [vmem:[%s1847_s3 + $0xb0] sm:$0xff]   ;;  %v1373_v6 = vld [vmem:[%s1847_s3 + $0xb8] sm:$0xff]  }
  0x35   :  { %1198 = vmatpush3.bf16.msra.mxu1 %v1357_v53 }
  0x36   :  { %1287 = vmatpush3.bf16.msra.mxu0 %v1358_v54  ;;  %1199 = vmatprep.subr.bf16.mxu1 %v1359_v55 }
  0x37   :  { %1288 = vmatprep.subr.bf16.mxu0 %v1413_v2 }
  0x39   :  { %1200 = vmatpush3.bf16.msra.mxu1 %v1360_v56 }
  0x3a   :  { %1289 = vmatpush3.bf16.msra.mxu0 %v1361_v57  ;;  %1201 = vmatprep.subr.bf16.mxu1 %v1362_v58 }
  0x3b   :  { %1290 = vmatprep.subr.bf16.mxu0 %v1413_v2 }
  0x3d   :  { %1202 = vmatpush3.bf16.msra.mxu1 %v1363_v59 }
  0x3e   :  { %1291 = vmatpush3.bf16.msra.mxu0 %v1364_v60  ;;  %1203 = vmatprep.subr.bf16.mxu1 %v1365_v61 }
  0x3f   :  { %1292 = vmatprep.subr.bf16.mxu0 %v1413_v2 }
  0x41   :  { %1204 = vmatpush3.bf16.msra.mxu1 %v1366_v62 }
  0x42   :  { %1293 = vmatpush3.bf16.msra.mxu0 %v1367_v63  ;;  %1205 = vmatprep.subr.bf16.mxu1 %v1368_v0 }
  0x43   :  { %1294 = vmatprep.subr.bf16.mxu0 %v1413_v2 }
  0x45   :  { %1206 = vmatpush3.bf16.msra.mxu1 %v1369_v1 }
  0x46   :  { %1295 = vmatpush3.bf16.msra.mxu0 %v1370_v3  ;;  %1207 = vmatprep.subr.bf16.mxu1 %v1371_v4 }
  0x47   :  { %1296 = vmatprep.subr.bf16.mxu0 %v1413_v2 }
  0x49   :  { %1208 = vmatpush3.bf16.msra.mxu1 %v1372_v5 }
  0x4a   :  { %1297 = vmatpush3.bf16.msra.mxu0 %v1373_v6  ;;  %1302 = vmatprep.subr.bf16.mxu1 %v1413_v2 }
  0xdc   :  { %v305_v8 = vpop.f32.mrb[0].mxu0 }
  0xdd   :  { %v1240_v9 = vpop.f32.mrb[1].mxu0 }
  0xde   :  { %v308_v10 = vpop.f32.mrb[2].mxu0 }
  0xdf   :  { %v1241_v11 = vpop.f32.mrb[3].mxu0 }
  0xe4   :  { %v313_v13 = vpop.f32.mrb[4].mxu0 }
  0xe5   :  { %v1244_v14 = vpop.f32.mrb[5].mxu0 }
  0xe6   :  { %v316_v15 = vpop.f32.mrb[6].mxu0 }
  0xe7   :  { %v1245_v18 = vpop.f32.mrb[7].mxu0 }
  0xea   :  { %v383_v21 = vpop.f32.mrb[0].mxu1 }
  0xeb   :  { %v384_v23 = vadd.f32 %v383_v21, %v305_v8  ;;  %v1256_v25 = vpop.f32.mrb[1].mxu1 }
  0xec   :  { %v321_v19 = vpop.f32.mrb[8].mxu0  ;;  %v386_v28 = vpop.f32.mrb[2].mxu1 }
  0xed   :  { %v1248_v22 = vpop.f32.mrb[9].mxu0  ;;  %v387_v26 = vadd.f32 %v386_v28, %v308_v10  ;;  %v1257_v30 = vpop.f32.mrb[3].mxu1 }
  0xee   :  { %v324_v27 = vpop.f32.mrb[10].mxu0 }
  0xef   :  { %v1249_v29 = vpop.f32.mrb[11].mxu0 }
  0xf2   :  { %v391_v34 = vpop.f32.mrb[4].mxu1 }
  0xf3   :  { %v392_v37 = vadd.f32 %v391_v34, %v313_v13  ;;  %v1260_v24 = vpop.f32.mrb[5].mxu1 }
  0xf4   :  { %v468_v31 = vpop.f32.mrb[12].mxu0  ;;  %v394_v20 = vpop.f32.mrb[6].mxu1 }
  0xf5   :  { %v491_v35 = vadd.f32 %v468_v31, %v384_v23  ;;  %v1272_v36 = vpop.f32.mrb[13].mxu0  ;;  %v395_v40 = vadd.f32 %v394_v20, %v316_v15  ;;  %v1261_v41 = vpop.f32.mrb[7].mxu1 }
  0xf6   :  { %v471_v16 = vpop.f32.mrb[14].mxu0 }
  0xf7   :  { %v504_v32 = vadd.f32 %v1125_v33, %v491_v35  ;;  %v492_v38 = vadd.f32 %v471_v16, %v387_v26  ;;  %v1273_v39 = vpop.f32.mrb[15].mxu0 }
  0xf9   :  { %v1720_v42 = vmax.f32 %v504_v32, 0.0  ;;  %v505_v44 = vadd.f32 %v1125_v33, %v492_v38 }
  0xfa   :  { %v399_v49 = vpop.f32.mrb[8].mxu1 }
  0xfb   :  { %v511_v45 = vmax.f32 %v505_v44, 0.0  ;;  %v516_v46 = vrot.slane %v1720_v42, 1  ;;  %v534_v12 = vrot.slane %v1720_v42, 2  ;;  %v400_v52 = vadd.f32 %v399_v49, %v321_v19  ;;  %v1264_v53 = vpop.f32.mrb[9].mxu1 }
  0xfc   :  { %v476_v43 = vpop.f32.mrb[16].mxu0  ;;  %v402_v57 = vpop.f32.mrb[10].mxu1 }
  0xfd   :  { %v517_v47 = vrot.slane %v511_v45, 1  ;;  %v535_v48 = vrot.slane %v511_v45, 2  ;;  %v493_v50 = vadd.f32 %v476_v43, %v392_v37  ;;  %v1276_v51 = vpop.f32.mrb[17].mxu0  ;;  %v403_v62 = vadd.f32 %v402_v57, %v324_v27  ;;  %v1265_v63 = vpop.f32.mrb[11].mxu1 }
  0xfe   :  { %v479_v54 = vpop.f32.mrb[18].mxu0  ;;  %v1374_v63 = vld [vmem:[%s1849_s5] sm:$0xff]  }
  0xff   :  { %v526_v55 = vsel %vm198_vm3, %v516_v46, %v517_v47  ;;  %v545_v56 = vsel %vm540_vm1, %v534_v12, %v535_v48  ;;  %v506_v58 = vadd.f32 %v1125_v33, %v493_v50  ;;  %v494_v59 = vadd.f32 %v479_v54, %v395_v40  ;;  %v1277_v60 = vpop.f32.mrb[19].mxu0 }
 0x100   :  { %v528_v61 = vmax.f32 %v1720_v42, %v526_v55 }
 0x101   :  { %v512_v0 = vmax.f32 %v506_v58, 0.0  ;;  %v507_v1 = vadd.f32 %v1125_v33, %v494_v59 }
 0x102   :  { %v547_v3 = vmax.f32 %v528_v61, %v545_v56 }
 0x103   :  { %v518_v4 = vrot.slane %v512_v0, 1  ;;  %v536_v5 = vrot.slane %v512_v0, 2  ;;  %v513_v6 = vmax.f32 %v507_v1, 0.0  ;;  %v1377_v1 = vld [vmem:[%s1849_s5 + $0x18] sm:$0xff]  }
 0x104   :  { %553 = vst [vmem:[#allocation2] sm:$0xff] %v547_v3  ;;  %v484_v8 = vpop.f32.mrb[20].mxu0 }
 0x105   :  { %v525_v9 = vsel %vm198_vm3, %v517_v47, %v518_v4  ;;  %v544_v10 = vsel %vm540_vm1, %v535_v48, %v536_v5  ;;  %v519_v11 = vrot.slane %v513_v6, 1  ;;  %v537_v13 = vrot.slane %v513_v6, 2  ;;  %v1280_v14 = vpop.f32.mrb[21].mxu0 }
 0x106   :  { %v529_v15 = vmax.f32 %v511_v45, %v525_v9  ;;  %v495_v18 = vadd.f32 %v484_v8, %v400_v52  ;;  %v487_v19 = vpop.f32.mrb[22].mxu0  ;;  %v566_v47 = vand.u32 7, %v1482_v7  ;;  %v573_v48 = vand.u32 7, %v1501_v17  ;;  %v1375_v7 = vld [vmem:[%s1849_s5 + $0x8] sm:$0xff]  }
 0x107   :  { %v524_v21 = vsel %vm198_vm3, %v518_v4, %v519_v11  ;;  %v543_v22 = vsel %vm540_vm1, %v536_v5, %v537_v13  ;;  %v496_v23 = vadd.f32 %v487_v19, %v403_v62  ;;  %v1281_v25 = vpop.f32.mrb[23].mxu0  ;;  %v1126_v5 = vld [vmem:[%s1848_s4] ss:$0 sm:$0xff] }
 0x108   :  { %v548_v27 = vmax.f32 %v529_v15, %v544_v10  ;;  %v530_v28 = vmax.f32 %v512_v0, %v524_v21  ;;  %v508_v29 = vadd.f32 %v1125_v33, %v495_v18  ;;  %vm1752_vm10 = vcmp.ne.s32.totalorder %v573_v48, 0  ;;  %v1376_v0 = vld [vmem:[%s1849_s5 + $0x10] sm:$0xff]  }
 0x109   :  { %v509_v26 = vadd.f32 %v1125_v33, %v496_v23  ;;  %vm1756_vm11 = vcmp.ne.s32.totalorder %v566_v47, 0  ;;  %vm1760_vm12 = vcmp.ne.s32.totalorder %v573_v48, 7  ;;  %vm1764_vm13 = vcmp.ne.s32.totalorder %v566_v47, 7  ;;  %v1381_v47 = vld [vmem:[%s1851_s7 + $0x18] sm:$0xff]   ;;  %v1161_v48 = vld [vmem:[%s1850_s6] ss:$0 sm:$0xff] }
 0x10a   :  { %554 = vst [vmem:[#allocation2 + $0x8] sm:$0xff] %v548_v27  ;;  %v549_v30 = vmax.f32 %v530_v28, %v543_v22  ;;  %v514_v31 = vmax.f32 %v508_v29, 0.0  ;;  %vm1153_vm14 = vmpackc.low %vm1752_vm10, %vm1756_vm11  ;;  %s1415_s6 = smov [#allocation3]  }
 0x10b   :  { %v515_v34 = vmax.f32 %v509_v26, 0.0  ;;  %vm1158_vm15 = vmpackc.low %vm1760_vm12, %vm1764_vm13 }
 0x10c   :  { %555 = vst [vmem:[#allocation2 + $0x10] sm:$0xff] %v549_v30  ;;  %v520_v35 = vrot.slane %v514_v31, 1  ;;  %v538_v36 = vrot.slane %v514_v31, 2 }
 0x10d   :  { %v521_v37 = vrot.slane %v515_v34, 1  ;;  %v539_v24 = vrot.slane %v515_v34, 2 }
 0x10e   :  { %v523_v16 = vsel %vm198_vm3, %v519_v11, %v520_v35  ;;  %v542_v20 = vsel %vm540_vm1, %v537_v13, %v538_v36 }
 0x10f   :  { %v531_v32 = vmax.f32 %v513_v6, %v523_v16  ;;  %v522_v38 = vsel %vm198_vm3, %v520_v35, %v521_v37  ;;  %v527_v33 = vsel %vm198_vm3, %v521_v37, %v516_v46  ;;  %v541_v39 = vsel %vm540_vm1, %v538_v36, %v539_v24 }
 0x110   :  { %v532_v40 = vmax.f32 %v514_v31, %v522_v38  ;;  %v533_v41 = vmax.f32 %v515_v34, %v527_v33  ;;  %v546_v42 = vsel %vm540_vm1, %v539_v24, %v534_v12 }
 0x111   :  { %v550_v44 = vmax.f32 %v531_v32, %v542_v20 }
 0x112   :  { %v551_v45 = vmax.f32 %v532_v40, %v541_v39  ;;  %v552_v43 = vmax.f32 %v533_v41, %v546_v42  ;;  %v1378_v42 = vld [vmem:[%s1851_s7] sm:$0xff]  }
 0x113   :  { %556 = vst [vmem:[#allocation2 + $0x18] sm:$0xff] %v550_v44  ;;  %v559_v49 = vld [vmem:[#allocation2] ss:$3 sm:$0xff] }
 0x114   :  { %557 = vst [vmem:[#allocation2 + $0x20] sm:$0xff] %v551_v45  ;;  %558 = vst [vmem:[#allocation2 + $0x28] sm:$0xff] %v552_v43  ;;  %v588_v51 = vrot.slane %v559_v49, 7  ;;  %v600_v54 = vrot.slane %v559_v49, 1  ;;  %v1379_v45 = vld [vmem:[%s1851_s7 + $0x8] sm:$0xff]   ;;  %v1380_v43 = vld [vmem:[%s1851_s7 + $0x10] sm:$0xff]  }
 0x115   :  { %s1099_s7 = sshll.u32 %s1415_s6, 4  ;;  %s1100_s7 = int_to_ptr.vmem [resolvable:$true] %s1099_s7 }
 0x116   :  { %s1389_s25 = scalar_lea.vmem %s1100_s7, 32  ;;  %p1394_p1 = scmp.lt.s32.totalorder %s1100_s7, %s1100_s7 }
 0x117   :  { %p1390_p0 = scmp.ne.s32.totalorder %s1100_s7, %s1389_s25  ;;  %p1395_p2 = scmp.lt.s32.totalorder %s1389_s25, %s1389_s25 }
 0x119   :  { %p1396_p3 = por %p1395_p2, %p1394_p1 }
 0x11b   :  { %v561_v12 = vld [vmem:[#allocation2 + $0x18] ss:$3 sm:$0xff]  ;;  %p1397_p4 = pnand %p1396_p3, %p1390_p0 }
 0x11c   :  { %v589_v17 = vrot.slane %v561_v12, 7  ;;  %v601_v55 = vrot.slane %v561_v12, 1  ;;  %v611_v56 = vpack.c.bf16 %v561_v12, %v559_v49 }
 0x11e   :  { %v590_v57 = vsel %vm161_vm2, %v588_v51, %v589_v17  ;;  %v591_v58 = vsel %vm161_vm2, %v589_v17, %v588_v51  ;;  %v602_v59 = vsel %vm198_vm3, %v600_v54, %v601_v55  ;;  %v603_v60 = vsel %vm198_vm3, %v601_v55, %v600_v54  ;;  %844 = vmatprep.mubr.bf16.mxu1 %v611_v56 }
 0x11f   :  { %v1154_v61 = vpack.c.bf16 %v590_v57, %v591_v58  ;;  %v1159_v62 = vpack.c.bf16 %v603_v60, %v602_v59  ;;  %vm896_vm2 = vcmask 523264   ;;  %vm932_vm3 = vcmask 1041409  }
 0x121   :  { %1155 = vmatmul.mubr.msk.bf16.vlgmr.msra.gmra.mrb[12].mxu1 %vm1153_vm14, %v1154_v61  ;;  %1299 = vmatmul.mubr.msk.bf16.vlgmr.msra.gmra.mrb[24].mxu0 %vm1158_vm15, %v1159_v62 }
 0x122   :  { %1310 = vmatprep.mubr.msk.bf16.mxu1 %vm1414_vm0, %v1413_v2  ;;  %1303 = vmatpush3.bf16.msra.mxu1 %v1374_v63 }
 0x123   :  { %1304 = vmatprep.subr.bf16.mxu1 %v1413_v2 }
 0x126   :  { %1305 = vmatpush3.bf16.msra.mxu1 %v1375_v7 }
 0x127   :  { %1306 = vmatprep.subr.bf16.mxu1 %v1413_v2 }
 0x12a   :  { %1307 = vmatpush3.bf16.msra.mxu1 %v1376_v0 }
 0x12b   :  { %1308 = vmatprep.subr.bf16.mxu1 %v1413_v2 }
 0x12e   :  { %1309 = vmatpush3.bf16.msra.mxu1 %v1377_v1 }
 0x12f   :  { %1314 = vmatprep.subr.bf16.mxu1 %v1413_v2 }
 0x1f4   :  { %v1209_v3 = vpop.f32.mrb[12].mxu1  ;;  %v887_v4 = vpop.f32.mrb[24].mxu0 }
 0x1f5   :  { %v1210_v6 = vpop.f32.mrb[13].mxu1  ;;  %v1300_v8 = vpop.f32.mrb[25].mxu0 }
 0x1f6   :  { %v1211_v9 = vadd.f32 %v1210_v6, %v1209_v3  ;;  %v1212_v10 = vpop.f32.mrb[14].mxu1  ;;  %v890_v11 = vpop.f32.mrb[26].mxu0 }
 0x1f7   :  { %v1213_v13 = vpop.f32.mrb[15].mxu1  ;;  %v1301_v14 = vpop.f32.mrb[27].mxu0 }
 0x1f8   :  { %v847_v15 = vadd.f32 %v1211_v9, %v1126_v5  ;;  %v1214_v18 = vadd.f32 %v1213_v13, %v1212_v10 }
 0x1fa   :  { %v888_v19 = vadd.f32 %v887_v4, %v847_v15  ;;  %v850_v21 = vadd.f32 %v1214_v18, %v1126_v5 }
 0x1fc   :  { %v894_v22 = vmax.f32 %v888_v19, 0.0  ;;  %v891_v23 = vadd.f32 %v890_v11, %v850_v21 }
 0x1fe   :  { %v895_v25 = vmax.f32 %v891_v23, 0.0  ;;  %v897_v27 = vsel %vm896_vm2, %v894_v22, -inf }
 0x1ff   :  { %v898_v28 = vrot.slane %v897_v27, 4 }
 0x200   :  { %v904_v29 = vsel %vm896_vm2, %v895_v25, -inf }
 0x201   :  { %v899_v26 = vmax.f32 %v897_v27, %v898_v28  ;;  %v905_v30 = vrot.slane %v904_v29, 4 }
 0x203   :  { %v900_v31 = vrot.slane %v899_v26, 2  ;;  %v906_v34 = vmax.f32 %v904_v29, %v905_v30 }
 0x205   :  { %v901_v35 = vmax.f32 %v899_v26, %v900_v31  ;;  %v907_v36 = vrot.slane %v906_v34, 2 }
 0x207   :  { %v902_v37 = vrot.slane %v901_v35, 1  ;;  %v908_v24 = vmax.f32 %v906_v34, %v907_v36 }
 0x209   :  { %v903_v16 = vmax.f32 %v901_v35, %v902_v37  ;;  %v909_v20 = vrot.slane %v908_v24, 1 }
 0x20b   :  { %v910_v32 = vmax.f32 %v908_v24, %v909_v20  ;;  %v911_v38 = vpack.c.bf16 %v903_v16, %v903_v16 }
 0x20d   :  { %v912_v33 = vpack.c.bf16 %v910_v32, %v910_v32  ;;  %v930_v39 = vunpack.c.l.b16 %v911_v38 }
 0x20f   :  { %v931_v40 = vunpack.c.l.b16 %v912_v33 }
 0x211   :  { %v933_v41 = vsel %vm932_vm3, %v931_v40, %v930_v39 }
 0x212   :  { %v934_v44 = vpack.c.b16 %v933_v41, %v933_v41 }
 0x214   :  { %1311 = vmatmul.mubr.msk.bf16.vlgmr.msra.gmra.mrb[16].mxu1 %vm896_vm2, %v934_v44 }
 0x215   :  { %1315 = vmatpush3.bf16.msra.mxu1 %v1378_v42  ;;  %1322 = vmatprep.mubr.msk.bf16.mxu1 %vm1414_vm0, %v1413_v2 }
 0x216   :  { %1316 = vmatprep.subr.bf16.mxu1 %v1413_v2 }
 0x219   :  { %1317 = vmatpush3.bf16.msra.mxu1 %v1379_v45 }
 0x21a   :  { %1318 = vmatprep.subr.bf16.mxu1 %v1413_v2 }
 0x21d   :  { %1319 = vmatpush3.bf16.msra.mxu1 %v1380_v43 }
 0x21e   :  { %1320 = vmatprep.subr.bf16.mxu1 %v1413_v2  ;;  %v1167_v2 = vld [vmem:[%s1852_s8] ss:$0 sm:$0xff] }
 0x221   :  { %1321 = vmatpush3.bf16.msra.mxu1 %v1381_v47 }
 0x2e7   :  { %v996_v49 = vpop.f32.mrb[16].mxu1 }
 0x2e8   :  { %v997_v46 = vadd.f32 %v1161_v48, %v996_v49  ;;  %v1312_v50 = vpop.f32.mrb[17].mxu1 }
 0x2e9   :  { %v999_v12 = vpop.f32.mrb[18].mxu1 }
 0x2ea   :  { %v1002_v51 = vmax.f32 %v997_v46, 0.0  ;;  %v1313_v52 = vpop.f32.mrb[19].mxu1 }
 0x2ec   :  { %v1003_v53 = vpack.c.bf16 %v1002_v51, %v1002_v51 }
 0x2ee   :  { %1323 = vmatmul.mubr.msk.bf16.vlgmr.msra.gmra.mrb[20].mxu1 %vm896_vm2, %v1003_v53 }
 0x3c1   :  { %v1080_v17 = vpop.f32.mrb[20].mxu1 }
 0x3c2   :  { %v1081_v54 = vadd.f32 %v1167_v2, %v1080_v17  ;;  %v1324_v55 = vpop.f32.mrb[21].mxu1 }
 0x3c3   :  { %v1083_v56 = vpop.f32.mrb[22].mxu1 }
 0x3c4   :  { %v1173_v57 = vmul.f32 -1.442695, %v1081_v54  ;;  %v1325_v58 = vpop.f32.mrb[23].mxu1 }
 0x3c6   :  { %1385 = vpow2.f32 %v1173_v57 }
 0x3d0   :  { %v1386_v59 = vpop.eup %1385 }
 0x3d1   :  { %v1089_v60 = vadd.f32 1.0, %v1386_v59 }
 0x3d3   :  { %1387 = vrcp.f32 %v1089_v60 }
 0x3dd   :  { %v1388_v61 = vpop.eup %1387 }
 0x3de   :  { %1092 = vst [vmem:[#allocation3] sm:$0x3] %v1388_v61 }
 0x3df   :  { %1400 = shalt.err (!%p1397_p4)
}
 0x3e0   :  { %s1401_s26 = scalar_lea.hbm %s1853_s9, 32 }
 0x3e1   :  { %p1402_p5 = scmp.ne.s32.totalorder %s1853_s9, %s1401_s26  ;;  %p1405_p6 = scmp.lt.u32.totalorder %s1401_s26, %s1853_s9 }
 0x3e3   :  { %p1407_p7 = pnand %p1405_p6, %p1402_p5 }
 0x3e5   :  { %1410 = shalt.err (!%p1407_p7)
}
 0x3e6   :  { %1102 = dma.vmem_to_hbm [thread:$0]  %s1100_s7, 32, %s1853_s9, [#allocation4]  }
 0x3e7   :  { %1411 = dma.done.wait [#allocation4], 32  }
 0x3e8   :  { %1412 = vsyncadd [#allocation4], 4294967264 }
 0x3e9   :  { %1106 = vsyncpa [#allocation4], 1 }

</bundles_post_ra>
